<compile_context>
chip_gen: v7x
topology: tpu7x:2x2x1
jax: 0.10.0
libtpu: 0.0.40
codegen_flags: <defaults>
</compile_context>

<pallas_src>
import functools
import math

import jax
import jax.numpy as jnp
from jax.experimental import pallas as pl
from jax.experimental.pallas import tpu as pltpu

# TODO(synk): arbitrary user-supplied EthicalRule.detection_fn callables
# (regex / text checks etc.) have no Pallas equivalent; only numeric tensor
# rules are implemented.


def _ethical_stats_kernel(x_ref, t_ref, sse_ref, sum_ref, max_ref, *,
                          rows, feat_len, tiles_per_chunk, tile_n, ragged):
    g = pl.program_id(0)          # feature super-chunk ('parallel')
    k = pl.program_id(1)          # feature tile        ('arbitrary' reduction)

    @pl.when(k == 0)
    def _init():
        sse_ref[...] = jnp.zeros_like(sse_ref)
        sum_ref[...] = jnp.zeros_like(sum_ref)
        max_ref[...] = jnp.zeros_like(max_ref)   # |x| >= 0, so 0 is safe

    x = x_ref[...].astype(jnp.float32)           # (rows, tile_n), upcast in-kernel
    t = t_ref[...].astype(jnp.float32)

    def accumulate(xv, tv):
        diff = xv - tv
        ssq = sse_ref[...]
        sx = sum_ref[...]
        mx = max_ref[...]
        # Fold 128-lane groups elementwise into the per-lane accumulators:
        # pure VALU, no cross-lane (XLU) reduction in the hot loop.
        for lg in range(tile_n // 128):
            sl = slice(lg * 128, (lg + 1) * 128)
            d = diff[:, sl]
            xs = xv[:, sl]
            ssq = ssq + d * d
            sx = sx + xs
            mx = jnp.maximum(mx, jnp.abs(xs))
        sse_ref[...] = ssq
        sum_ref[...] = sx
        max_ref[...] = mx

    if ragged:
        start = (g * tiles_per_chunk + k) * tile_n
        is_clean = (start + tile_n) <= feat_len

        @pl.when(is_clean)
        def _fast_path():
            accumulate(x, t)

        @pl.when(jnp.logical_not(is_clean))
        def _masked_path():
            lane = jax.lax.broadcasted_iota(jnp.int32, (rows, tile_n), 1)
            valid = (start + lane) < feat_len
            accumulate(jnp.where(valid, x, 0.0), jnp.where(valid, t, 0.0))
    else:
        accumulate(x, t)


def _choose_row_factor(batch, feat, pack):
    """Smallest r dividing feat so batch*r fills the sublane height `pack`."""
    if batch >= pack:
        return 1
    need = -(-pack // batch)                      # ceil(pack / batch)
    fallback = None
    for r in range(need, min(feat, 16 * pack) + 1):
        if feat % r:
            continue
        if (batch * r) % pack == 0:
            return r                              # no sublane padding at all
        if fallback is None:
            fallback = r
    return fallback or 1


def ethical_loss(outputs, targets, *, ethical_weight=1.0, harm_threshold=3.0,
                 fairness_threshold=1.0, tile_n=None):
    """outputs / targets: (B, ...) tensors.  Returns scalar f32 loss."""
    B = outputs.shape[0]
    N = math.prod(outputs.shape[1:])
    itemsize = max(outputs.dtype.itemsize, targets.dtype.itemsize)
    pack = 8 * max(1, 4 // itemsize)              # sublanes per vreg tile

    # Sublane fill: view each sample as r rows -> (B*r, N/r).
    r = _choose_row_factor(B, N, pack)
    rows = B * r
    M = N // r
    x2d = outputs.reshape(rows, M)                # native dtype, no f32 pre-cast
    t2d = targets.reshape(rows, M)

    # Very small per-row feature length: zero-pad to one full lane group
    # (zeros are inert for SSE / sum / max|x|, so no masking needed for them).
    if M < 128:
        padw = 128 - M
        x2d = jnp.pad(x2d, ((0, 0), (0, padw)))
        t2d = jnp.pad(t2d, ((0, 0), (0, padw)))
        M_eff = 128
    else:
        M_eff = M

    # Tile size: lanes multiple of 128, <=1 MiB per input block measured with
    # padded-sublane bytes, unroll-capped; never larger than the feature axis.
    rows_padded = -(-rows // pack) * pack
    m_pad = -(-M_eff // 128) * 128
    if tile_n is None:
        tn = (((1 << 20) // (rows_padded * itemsize)) // 128) * 128
        tn = max(128, min(tn, 16384))
    else:
        tn = max(128, (-(-tile_n // 128)) * 128)
    tn = min(tn, m_pad)
    if tn > M_eff:                                # keep blocks within the array dim
        tn = max(128, (M_eff // 128) * 128)

    nk_total = pl.cdiv(M_eff, tn)
    ng = 2 if nk_total >= 2 else 1                # feed both v7x TensorCores
    nk = pl.cdiv(nk_total, ng)
    ragged = (ng * nk * tn != M_eff)

    kernel = functools.partial(
        _ethical_stats_kernel, rows=rows, feat_len=M_eff,
        tiles_per_chunk=nk, tile_n=tn, ragged=ragged)

    def in_map(g, k):
        # Clamp: the last chunk may own tiles past the array; they get fully
        # masked in-kernel (their logical start >= feat_len).
        return (0, jnp.minimum(g * nk + k, nk_total - 1))

    out_map = lambda g, k: (g, 0, 0)
    out_struct = jax.ShapeDtypeStruct((ng, rows, 128), jnp.float32)

    sse_p, sum_p, max_p = pl.pallas_call(
        kernel,
        out_shape=(out_struct, out_struct, out_struct),
        grid_spec=pltpu.PrefetchScalarGridSpec(
            num_scalar_prefetch=0,
            grid=(ng, nk),
            in_specs=[pl.BlockSpec((rows, tn), in_map),
                      pl.BlockSpec((rows, tn), in_map)],
            out_specs=[pl.BlockSpec((None, rows, 128), out_map)] * 3,
        ),
        compiler_params=pltpu.CompilerParams(
            dimension_semantics=("parallel", "arbitrary"),
            vmem_limit_bytes=32 * 1024 * 1024),
        cost_estimate=pl.CostEstimate(
            flops=6 * B * N,
            transcendentals=0,
            bytes_accessed=B * N * (outputs.dtype.itemsize
                                    + targets.dtype.itemsize)),
    )(x2d, t2d)

    # Tiny O(B) epilogue: combine per-chunk / per-lane / per-row partials and
    # apply the constitution's rules + penalty.
    sum_row = jnp.sum(sum_p, axis=(0, 2))                 # (rows,)
    max_row = jnp.max(max_p, axis=(0, 2))                 # (rows,)
    sum_s = sum_row.reshape(B, r).sum(axis=1)             # per-sample sum(x)
    max_s = max_row.reshape(B, r).max(axis=1)             # per-sample max|x|

    base_loss = jnp.sum(sse_p) / jnp.float32(B * N)       # MSE, mean reduction
    harm = max_s > jnp.float32(harm_threshold)            # 'block' rule
    fair = (sum_s / jnp.float32(N)) > jnp.float32(fairness_threshold)  # 'warn'
    n_viol = harm.astype(jnp.float32) + fair.astype(jnp.float32)
    penalty = jnp.sum(jnp.where(harm, jnp.float32(ethical_weight) * n_viol,
                                0.0)) / jnp.float32(B)
    return base_loss + penalty


def _reference(outputs, targets, *, ethical_weight=1.0,
               harm_threshold=3.0, fairness_threshold=1.0):
    """Pure-JAX reference mirroring the PyTorch per-sample loop semantics."""
    B = outputs.shape[0]
    x = outputs.reshape(B, -1).astype(jnp.float32)
    t = targets.reshape(B, -1).astype(jnp.float32)
    base = jnp.mean((x - t) ** 2)
    harm = (jnp.max(jnp.abs(x), axis=1) > harm_threshold).astype(jnp.float32)
    fair = (jnp.mean(x, axis=1) > fairness_threshold).astype(jnp.float32)
    n_viol = harm + fair
    pen = jnp.sum(harm * (ethical_weight * n_viol)) / B   # only failed samples
    return base + pen


if __name__ == "__main__":
    key = jax.random.PRNGKey(0)
    k1, k2, k3, k4, k5, k6 = jax.random.split(key, 6)

    # --- primary NCHW shape (B=2, C=4, 16x16): sublane-filled, single tile ---
    o1 = jax.random.normal(k1, (2, 4, 16, 16), dtype=jnp.float32) * 2.0
    t1 = jax.random.normal(k2, (2, 4, 16, 16), dtype=jnp.float32)
    l1 = jax.block_until_ready(ethical_loss(o1, t1))
    r1 = jax.block_until_ready(_reference(o1, t1))
    assert jnp.allclose(l1, r1, rtol=1e-5, atol=1e-5), (l1, r1)

    # --- multi-tile reduction + 2-chunk 'parallel' axis + masked ragged tail ---
    o2 = jax.random.normal(k3, (2, 3, 20, 20), dtype=jnp.float32) * 2.0
    t2 = jax.random.normal(k4, (2, 3, 20, 20), dtype=jnp.float32)
    l2 = jax.block_until_ready(ethical_loss(o2, t2, tile_n=128))
    r2 = jax.block_until_ready(_reference(o2, t2))
    assert jnp.allclose(l2, r2, rtol=1e-5, atol=1e-5), (l2, r2)

    # --- B=16 (no row-fill), ragged feature axis split across both chunks ---
    o3 = jax.random.normal(k5, (16, 1, 8, 36), dtype=jnp.float32) * 2.0
    t3 = jax.random.normal(k6, (16, 1, 8, 36), dtype=jnp.float32)
    l3 = jax.block_until_ready(ethical_loss(o3, t3))
    r3 = jax.block_until_ready(_reference(o3, t3))
    assert jnp.allclose(l3, r3, rtol=1e-5, atol=1e-5), (l3, r3)

    # --- bf16 native-dtype streaming (16-row sublane fill, in-kernel upcast) ---
    o4 = (jax.random.normal(k1, (2, 4, 16, 16), dtype=jnp.float32) * 2.0
          ).astype(jnp.bfloat16)
    t4 = jax.random.normal(k2, (2, 4, 16, 16),
                           dtype=jnp.float32).astype(jnp.bfloat16)
    l4 = jax.block_until_ready(ethical_loss(o4, t4))
    r4 = jax.block_until_ready(_reference(o4, t4))
    assert jnp.allclose(l4, r4, rtol=1e-4, atol=1e-4), (l4, r4)

    print("KERNEL_OK")
</pallas_src>

<mosaic_0001>
module attributes {stable_mosaic.version = 11 : i64} {
  func.func @_ethical_stats_kernel(%arg0: i32, %arg1: i32, %arg2: memref<8x256xf32, #tpu.memory_space<vmem>>, %arg3: memref<8x256xf32, #tpu.memory_space<vmem>>, %arg4: memref<1x8x128xf32, #tpu.memory_space<vmem>>, %arg5: memref<1x8x128xf32, #tpu.memory_space<vmem>>, %arg6: memref<1x8x128xf32, #tpu.memory_space<vmem>>) attributes {dimension_semantics = [#tpu.dimension_semantics<parallel>, #tpu.dimension_semantics<arbitrary>], iteration_bounds = array<i64: 1, 1>, scalar_prefetch = 0 : i64, scratch_operands = 0 : i64, tpu.core_type = #tpu.core_type<tc>, window_params = [{transform_indices = @transform_0, window_bounds = array<i64: 8, 256>}, {transform_indices = @transform_1, window_bounds = array<i64: 8, 256>}, {transform_indices = @transform_2, window_bounds = array<i64: 1, 8, 128>}, {transform_indices = @transform_3, window_bounds = array<i64: 1, 8, 128>}, {transform_indices = @transform_4, window_bounds = array<i64: 1, 8, 128>}]} {
    %c0_i32 = arith.constant 0 : i32
    %0 = arith.cmpi eq, %arg1, %c0_i32 : i32
    %1 = arith.extui %0 : i1 to i32
    %c0_i32_0 = arith.constant 0 : i32
    %2 = arith.cmpi ne, %1, %c0_i32_0 : i32
    scf.if %2 {
      %cst = arith.constant 0.000000e+00 : f32
      %35 = vector.broadcast %cst : f32 to vector<8x128xf32>
      %c0_22 = arith.constant 0 : index
      %c0_23 = arith.constant 0 : index
      %c0_24 = arith.constant 0 : index
      %36 = vector.load %arg4[%c0_22, %c0_23, %c0_24] : memref<1x8x128xf32, #tpu.memory_space<vmem>>, vector<1x8x128xf32>
      %37 = vector.shape_cast %36 : vector<1x8x128xf32> to vector<8x128xf32>
      %38 = vector.shape_cast %35 : vector<8x128xf32> to vector<1x8x128xf32>
      tpu.vector_store %arg4[%c0_22, %c0_23, %c0_24], %38 {strides = array<i32>} : memref<1x8x128xf32, #tpu.memory_space<vmem>>, vector<1x8x128xf32>,
      %cst_25 = arith.constant 0.000000e+00 : f32
      %39 = vector.broadcast %cst_25 : f32 to vector<8x128xf32>
      %c0_26 = arith.constant 0 : index
      %c0_27 = arith.constant 0 : index
      %c0_28 = arith.constant 0 : index
      %40 = vector.load %arg5[%c0_26, %c0_27, %c0_28] : memref<1x8x128xf32, #tpu.memory_space<vmem>>, vector<1x8x128xf32>
      %41 = vector.shape_cast %40 : vector<1x8x128xf32> to vector<8x128xf32>
      %42 = vector.shape_cast %39 : vector<8x128xf32> to vector<1x8x128xf32>
      tpu.vector_store %arg5[%c0_26, %c0_27, %c0_28], %42 {strides = array<i32>} : memref<1x8x128xf32, #tpu.memory_space<vmem>>, vector<1x8x128xf32>,
      %cst_29 = arith.constant 0.000000e+00 : f32
      %43 = vector.broadcast %cst_29 : f32 to vector<8x128xf32>
      %c0_30 = arith.constant 0 : index
      %c0_31 = arith.constant 0 : index
      %c0_32 = arith.constant 0 : index
      %44 = vector.load %arg6[%c0_30, %c0_31, %c0_32] : memref<1x8x128xf32, #tpu.memory_space<vmem>>, vector<1x8x128xf32>
      %45 = vector.shape_cast %44 : vector<1x8x128xf32> to vector<8x128xf32>
      %46 = vector.shape_cast %43 : vector<8x128xf32> to vector<1x8x128xf32>
      tpu.vector_store %arg6[%c0_30, %c0_31, %c0_32], %46 {strides = array<i32>} : memref<1x8x128xf32, #tpu.memory_space<vmem>>, vector<1x8x128xf32>,
    } else {
    }
    %c0 = arith.constant 0 : index
    %c0_1 = arith.constant 0 : index
    %3 = vector.load %arg2[%c0, %c0_1] : memref<8x256xf32, #tpu.memory_space<vmem>>, vector<8x256xf32>
    %c0_2 = arith.constant 0 : index
    %c0_3 = arith.constant 0 : index
    %4 = vector.load %arg3[%c0_2, %c0_3] : memref<8x256xf32, #tpu.memory_space<vmem>>, vector<8x256xf32>
    %5 = arith.subf %3, %4 : vector<8x256xf32>
    %c0_4 = arith.constant 0 : index
    %c0_5 = arith.constant 0 : index
    %c0_6 = arith.constant 0 : index
    %6 = vector.load %arg4[%c0_4, %c0_5, %c0_6] : memref<1x8x128xf32, #tpu.memory_space<vmem>>, vector<1x8x128xf32>
    %7 = vector.shape_cast %6 : vector<1x8x128xf32> to vector<8x128xf32>
    %c0_7 = arith.constant 0 : index
    %c0_8 = arith.constant 0 : index
    %c0_9 = arith.constant 0 : index
    %8 = vector.load %arg5[%c0_7, %c0_8, %c0_9] : memref<1x8x128xf32, #tpu.memory_space<vmem>>, vector<1x8x128xf32>
    %9 = vector.shape_cast %8 : vector<1x8x128xf32> to vector<8x128xf32>
    %c0_10 = arith.constant 0 : index
    %c0_11 = arith.constant 0 : index
    %c0_12 = arith.constant 0 : index
    %10 = vector.load %arg6[%c0_10, %c0_11, %c0_12] : memref<1x8x128xf32, #tpu.memory_space<vmem>>, vector<1x8x128xf32>
    %11 = vector.shape_cast %10 : vector<1x8x128xf32> to vector<8x128xf32>
    %12 = vector.extract_strided_slice %5 {offsets = [0, 0], sizes = [8, 128], strides = [1, 1]} : vector<8x256xf32> to vector<8x128xf32>
    %13 = vector.extract_strided_slice %3 {offsets = [0, 0], sizes = [8, 128], strides = [1, 1]} : vector<8x256xf32> to vector<8x128xf32>
    %14 = arith.mulf %12, %12 : vector<8x128xf32>
    %15 = arith.addf %7, %14 : vector<8x128xf32>
    %16 = arith.addf %9, %13 : vector<8x128xf32>
    %17 = math.absf %13 : vector<8x128xf32>
    %18 = arith.maximumf %11, %17 : vector<8x128xf32>
    %19 = vector.extract_strided_slice %5 {offsets = [0, 128], sizes = [8, 128], strides = [1, 1]} : vector<8x256xf32> to vector<8x128xf32>
    %20 = vector.extract_strided_slice %3 {offsets = [0, 128], sizes = [8, 128], strides = [1, 1]} : vector<8x256xf32> to vector<8x128xf32>
    %21 = arith.mulf %19, %19 : vector<8x128xf32>
    %22 = arith.addf %15, %21 : vector<8x128xf32>
    %23 = arith.addf %16, %20 : vector<8x128xf32>
    %24 = math.absf %20 : vector<8x128xf32>
    %25 = arith.maximumf %18, %24 : vector<8x128xf32>
    %c0_13 = arith.constant 0 : index
    %c0_14 = arith.constant 0 : index
    %c0_15 = arith.constant 0 : index
    %26 = vector.load %arg4[%c0_13, %c0_14, %c0_15] : memref<1x8x128xf32, #tpu.memory_space<vmem>>, vector<1x8x128xf32>
    %27 = vector.shape_cast %26 : vector<1x8x128xf32> to vector<8x128xf32>
    %28 = vector.shape_cast %22 : vector<8x128xf32> to vector<1x8x128xf32>
    tpu.vector_store %arg4[%c0_13, %c0_14, %c0_15], %28 {strides = array<i32>} : memref<1x8x128xf32, #tpu.memory_space<vmem>>, vector<1x8x128xf32>,
    %c0_16 = arith.constant 0 : index
    %c0_17 = arith.constant 0 : index
    %c0_18 = arith.constant 0 : index
    %29 = vector.load %arg5[%c0_16, %c0_17, %c0_18] : memref<1x8x128xf32, #tpu.memory_space<vmem>>, vector<1x8x128xf32>
    %30 = vector.shape_cast %29 : vector<1x8x128xf32> to vector<8x128xf32>
    %31 = vector.shape_cast %23 : vector<8x128xf32> to vector<1x8x128xf32>
    tpu.vector_store %arg5[%c0_16, %c0_17, %c0_18], %31 {strides = array<i32>} : memref<1x8x128xf32, #tpu.memory_space<vmem>>, vector<1x8x128xf32>,
    %c0_19 = arith.constant 0 : index
    %c0_20 = arith.constant 0 : index
    %c0_21 = arith.constant 0 : index
    %32 = vector.load %arg6[%c0_19, %c0_20, %c0_21] : memref<1x8x128xf32, #tpu.memory_space<vmem>>, vector<1x8x128xf32>
    %33 = vector.shape_cast %32 : vector<1x8x128xf32> to vector<8x128xf32>
    %34 = vector.shape_cast %25 : vector<8x128xf32> to vector<1x8x128xf32>
    tpu.vector_store %arg6[%c0_19, %c0_20, %c0_21], %34 {strides = array<i32>} : memref<1x8x128xf32, #tpu.memory_space<vmem>>, vector<1x8x128xf32>,
    return
  }
  func.func @transform_0(%arg0: i32, %arg1: i32) -> (i32, i32) {
    %c1_i32 = arith.constant 1 : i32
    %0 = arith.muli %arg0, %c1_i32 : i32
    %1 = arith.addi %0, %arg1 : i32
    %c0_i32 = arith.constant 0 : i32
    %2 = arith.minsi %1, %c0_i32 : i32
    %c0_i32_0 = arith.constant 0 : i32
    %c0_i32_1 = arith.constant 0 : i32
    return %c0_i32_0, %2 : i32, i32
  }
  func.func @transform_1(%arg0: i32, %arg1: i32) -> (i32, i32) {
    %c1_i32 = arith.constant 1 : i32
    %0 = arith.muli %arg0, %c1_i32 : i32
    %1 = arith.addi %0, %arg1 : i32
    %c0_i32 = arith.constant 0 : i32
    %2 = arith.minsi %1, %c0_i32 : i32
    %c0_i32_0 = arith.constant 0 : i32
    %c0_i32_1 = arith.constant 0 : i32
    return %c0_i32_0, %2 : i32, i32
  }
  func.func @transform_2(%arg0: i32, %arg1: i32) -> (i32, i32, i32) {
    %c0_i32 = arith.constant 0 : i32
    %c0_i32_0 = arith.constant 0 : i32
    %c0_i32_1 = arith.constant 0 : i32
    return %arg0, %c0_i32, %c0_i32_0 : i32, i32, i32
  }
  func.func @transform_3(%arg0: i32, %arg1: i32) -> (i32, i32, i32) {
    %c0_i32 = arith.constant 0 : i32
    %c0_i32_0 = arith.constant 0 : i32
    %c0_i32_1 = arith.constant 0 : i32
    return %arg0, %c0_i32, %c0_i32_0 : i32, i32, i32
  }
  func.func @transform_4(%arg0: i32, %arg1: i32) -> (i32, i32, i32) {
    %c0_i32 = arith.constant 0 : i32
    %c0_i32_0 = arith.constant 0 : i32
    %c0_i32_1 = arith.constant 0 : i32
    return %arg0, %c0_i32, %c0_i32_0 : i32, i32, i32
  }
}

</mosaic_0001>

<bundles_post_ra>
// kernel: tpu_custom_call.1
= control target key start
LH: loop header
LB: loop body
LE: loop exit
PB: predicated region body
PF: predicated region fallthrough
CT: control target
= control target key end

     0   :  { %10 = vsyncpa [#allocation3], 0  ;;  %s357_s0 = inlined_call_operand.hbm [shape: f32[8,256], index: 0, kind: input, shape index: {}]   ;;  %s358_s1 = inlined_call_operand.hbm [shape: f32[8,256], index: 1, kind: input, shape index: {}]   ;;  %s359_s2 = inlined_call_operand.hbm [shape: f32[1,8,128], index: 2, kind: output, shape index: {0}]   ;;  %s360_s3 = inlined_call_operand.hbm [shape: f32[1,8,128], index: 3, kind: output, shape index: {1}]   ;;  %s361_s4 = inlined_call_operand.hbm [shape: f32[1,8,128], index: 4, kind: output, shape index: {2}]  }
   0x1   :  { %11 = vsyncpa [#allocation6], 0 }
   0x2   :  { %12 = vsyncpa [#allocation4], 0 }
   0x3   :  { %13 = vsyncpa [#allocation9], 0  ;;  %s260_s15 = smov [#allocation2]   ;;  %s261_s17 = smov [#allocation5]  }
   0x4   :  { %s26_s16 = sshll.u32 %s260_s15, 4  ;;  %s42_s18 = sshll.u32 %s261_s17, 4  ;;  %s27_s16 = int_to_ptr.vmem [resolvable:$true] %s26_s16  ;;  %s43_s18 = int_to_ptr.vmem [resolvable:$true] %s42_s18 }
   0x5   :  { %s142_s21 = scalar_lea.hbm %s357_s0, 256 }
   0x6   :  { %p143_p0 = scmp.ne.s32.totalorder %s357_s0, %s142_s21  ;;  %p146_p1 = scmp.lt.u32.totalorder %s142_s21, %s357_s0 }
   0x8   :  { %p148_p2 = pnand %p146_p1, %p143_p0 }
   0xa   :  { %151 = shalt.err (!%p148_p2)
}
   0xb   :  { %s152_s26 = scalar_lea.vmem %s27_s16, 256  ;;  %p157_p4 = scmp.lt.s32.totalorder %s27_s16, %s27_s16 }
   0xc   :  { %p153_p3 = scmp.ne.s32.totalorder %s27_s16, %s152_s26  ;;  %p158_p5 = scmp.lt.s32.totalorder %s152_s26, %s152_s26 }
   0xe   :  { %p159_p6 = por %p158_p5, %p157_p4 }
  0x10   :  { %p160_p7 = pnand %p159_p6, %p153_p3 }
  0x12   :  { %163 = shalt.err (!%p160_p7)
}
  0x13   :  { %29 = dma.hbm_to_vmem [thread:$0]  %s357_s0, 256, %s27_s16, [#allocation3]  }
  0x14   :  { %s164_s5 = scalar_lea.hbm %s358_s1, 256 }
  0x15   :  { %p165_p8 = scmp.ne.s32.totalorder %s358_s1, %s164_s5  ;;  %p168_p9 = scmp.lt.u32.totalorder %s164_s5, %s358_s1 }
  0x17   :  { %p170_p10 = pnand %p168_p9, %p165_p8 }
  0x19   :  { %173 = shalt.err (!%p170_p10)
}
  0x1a   :  { %s174_s10 = scalar_lea.vmem %s43_s18, 256  ;;  %p179_p12 = scmp.lt.s32.totalorder %s43_s18, %s43_s18 }
  0x1b   :  { %p175_p11 = scmp.ne.s32.totalorder %s43_s18, %s174_s10  ;;  %p180_p13 = scmp.lt.s32.totalorder %s174_s10, %s174_s10 }
  0x1d   :  { %p181_p0 = por %p180_p13, %p179_p12 }
  0x1f   :  { %p182_p1 = pnand %p181_p0, %p175_p11 }
  0x21   :  { %185 = shalt.err (!%p182_p1)
}
  0x22   :  { %45 = dma.hbm_to_vmem [thread:$0]  %s358_s1, 256, %s43_s18, [#allocation6]  }
  0x23   :  { %252 = dma.done.wait [#allocation3], 256  }
  0x24   :  { %253 = vsyncadd [#allocation3], 4294967040 }
  0x25   :  { %254 = dma.done.wait [#allocation6], 256  }
  0x26   :  { %255 = vsyncadd [#allocation6], 4294967040  ;;  %v67_v0 = vld [vmem:[#allocation2] sm:$0xff]  ;;  %v68_v1 = vld [vmem:[#allocation2 + $0x8] sm:$0xff]  ;;  %s262_s12 = smov [#allocation8]   ;;  %s263_s14 = smov [#allocation10]  }
  0x27   :  { %v69_v2 = vld [vmem:[#allocation5] sm:$0xff]  ;;  %s105_s13 = sshll.u32 %s262_s12, 4  ;;  %v70_v3 = vld [vmem:[#allocation5 + $0x8] sm:$0xff]  ;;  %v79_v5 = vand.u32 2147483647, %v67_v0  ;;  %s115_s15 = sshll.u32 %s263_s14, 4  ;;  %v83_v8 = vadd.f32 %v68_v1, %v67_v0  ;;  %s106_s13 = int_to_ptr.vmem [resolvable:$true] %s105_s13  ;;  %s314_s15 = int_to_ptr.vmem [resolvable:$true] %s115_s15 }
  0x28   :  { %v71_v4 = vsub.f32 %v67_v0, %v69_v2  ;;  %v84_v6 = vand.u32 2147483647, %v68_v1  ;;  %v72_v7 = vsub.f32 %v68_v1, %v70_v3  ;;  %s264_s1 = smov [#allocation7]   ;;  %s186_s17 = scalar_lea.vmem %s106_s13, 128 }
  0x29   :  { %v80_v10 = vmax.f32 %v79_v5, 0.0  ;;  %s95_s16 = sshll.u32 %s264_s1, 4  ;;  %87 = vst [vmem:[#allocation8] sm:$0xff] %v83_v8  ;;  %p187_p2 = scmp.ne.s32.totalorder %s106_s13, %s186_s17  ;;  %s96_s16 = int_to_ptr.vmem [resolvable:$true] %s95_s16 }
  0x2a   :  { %v76_v9 = vmul.f32 %v71_v4, %v71_v4  ;;  %v81_v11 = vmul.f32 %v72_v7, %v72_v7  ;;  %p191_p3 = scmp.lt.s32.totalorder %s106_s13, %s106_s13  ;;  %p192_p4 = scmp.lt.s32.totalorder %s186_s17, %s186_s17 }
  0x2b   :  { %v85_v12 = vmax.f32 %v80_v10, %v84_v6 }
  0x2c   :  { %p193_p5 = por %p192_p4, %p191_p3 }
  0x2e   :  { %p194_p6 = pnand %p193_p5, %p187_p2 }
  0x30   :  { %197 = shalt.err (!%p194_p6)
}
  0x31   :  { %s198_s20 = scalar_lea.hbm %s360_s3, 128 }
  0x32   :  { %p199_p7 = scmp.ne.s32.totalorder %s360_s3, %s198_s20  ;;  %p202_p8 = scmp.lt.u32.totalorder %s198_s20, %s360_s3 }
  0x34   :  { %p204_p9 = pnand %p202_p8, %p199_p7 }
  0x36   :  { %207 = shalt.err (!%p204_p9)
}
  0x37   :  { %108 = dma.vmem_to_hbm [thread:$0]  %s106_s13, 128, %s360_s3, [#allocation9]   ;;  %v82_v13 = vadd.f32 %v81_v11, %v76_v9  ;;  %88 = vst [vmem:[#allocation10] sm:$0xff] %v85_v12 }
  0x38   :  { %s208_s27 = scalar_lea.vmem %s314_s15, 128  ;;  %p213_p11 = scmp.lt.s32.totalorder %s314_s15, %s314_s15 }
  0x39   :  { %p209_p10 = scmp.ne.s32.totalorder %s314_s15, %s208_s27  ;;  %p214_p12 = scmp.lt.s32.totalorder %s208_s27, %s208_s27 }
  0x3b   :  { %p215_p13 = por %p214_p12, %p213_p11 }
  0x3d   :  { %p216_p0 = pnand %p215_p13, %p209_p10 }
  0x3f   :  { %219 = shalt.err (!%p216_p0)
}
  0x40   :  { %s220_s30 = scalar_lea.hbm %s361_s4, 128 }
  0x41   :  { %p221_p1 = scmp.ne.s32.totalorder %s361_s4, %s220_s30  ;;  %p224_p2 = scmp.lt.u32.totalorder %s220_s30, %s361_s4 }
  0x43   :  { %p226_p3 = pnand %p224_p2, %p221_p1 }
  0x45   :  { %229 = shalt.err (!%p226_p3)
}
  0x46   :  { %118 = dma.vmem_to_hbm [thread:$0]  %s314_s15, 128, %s361_s4, [#allocation9]   ;;  %86 = vst [vmem:[#allocation7] sm:$0xff] %v82_v13 }
  0x47   :  { %s230_s10 = scalar_lea.vmem %s96_s16, 128  ;;  %p235_p5 = scmp.lt.s32.totalorder %s96_s16, %s96_s16 }
  0x48   :  { %p231_p4 = scmp.ne.s32.totalorder %s96_s16, %s230_s10  ;;  %p236_p6 = scmp.lt.s32.totalorder %s230_s10, %s230_s10 }
  0x4a   :  { %p237_p7 = por %p236_p6, %p235_p5 }
  0x4c   :  { %p238_p8 = pnand %p237_p7, %p231_p4 }
  0x4e   :  { %241 = shalt.err (!%p238_p8)
}
  0x4f   :  { %s242_s12 = scalar_lea.hbm %s359_s2, 128 }
  0x50   :  { %p243_p9 = scmp.ne.s32.totalorder %s359_s2, %s242_s12  ;;  %p246_p10 = scmp.lt.u32.totalorder %s242_s12, %s359_s2 }
  0x52   :  { %p248_p11 = pnand %p246_p10, %p243_p9 }
  0x54   :  { %251 = shalt.err (!%p248_p11)
}
  0x55   :  { %98 = dma.vmem_to_hbm [thread:$0]  %s96_s16, 128, %s359_s2, [#allocation4]  }
  0x56   :  { %256 = dma.done.wait [#allocation4], 128  }
  0x57   :  { %257 = vsyncadd [#allocation4], 4294967168 }
  0x58   :  { %258 = dma.done.wait [#allocation9], 256  }
  0x59   :  { %259 = vsyncadd [#allocation9], 4294967040 }
  0x5a   :  { %128 = vsyncpa [#allocation3], 1 }
  0x5b   :  { %129 = vsyncpa [#allocation6], 1 }
  0x5c   :  { %130 = vsyncpa [#allocation4], 1 }
  0x5d   :  { %131 = vsyncpa [#allocation9], 1 }

</bundles_post_ra>
